<compile_context>
chip_gen: v5e
topology: v5e:2x2
jax: 0.10.0
libtpu: 0.0.40
codegen_flags: <defaults>
</compile_context>

<pallas_src>
import math

import jax
import jax.numpy as jnp
from jax.experimental import pallas as pl
from jax.experimental.pallas import tpu as pltpu


# ----------------------------------------------------------------------------
# Pallas kernel factory: one grid step = (Ht heads) x (Bt query blocks)
# ----------------------------------------------------------------------------
def _make_lsg_kernel(ht, bt, blk, has_sparse, scale):
    """Input-ref order: q, global_k, global_v, [sparse_k, sparse_v],
    k_main, k_halo0, k_halo1, v_main, v_halo0, v_halo1, mask; then the output."""

    def kernel(*refs):
        it = iter(refs)
        q_ref = next(it)
        gk_ref = next(it)
        gv_ref = next(it)
        if has_sparse:
            sk_ref = next(it)
            sv_ref = next(it)
        km_ref, kh0_ref, kh1_ref = next(it), next(it), next(it)
        vm_ref, vh0_ref, vh1_ref = next(it), next(it), next(it)
        m_ref = next(it)
        o_ref = next(it)

        d = q_ref.shape[-1]
        b_all = ht * bt

        # queries: (ht, bt*blk, d) -> (ht*bt, blk, d); fold 1/sqrt(d) into Q
        q = q_ref[0].reshape(b_all, blk, d) * scale

        # --- local K/V windows from the un-duplicated (padded) K/V -----------
        # concatenated buffer = padded tokens of blocks [kb*bt, kb*bt + bt + 2)
        k_loc = jnp.concatenate([km_ref[0], kh0_ref[0], kh1_ref[0]], axis=1)
        v_loc = jnp.concatenate([vm_ref[0], vh0_ref[0], vh1_ref[0]], axis=1)

        def _windows(x):  # (ht, (bt+2)*blk, d) -> (ht*bt, 3*blk, d)
            w = [x[:, i * blk:(i + 3) * blk, :] for i in range(bt)]
            return jnp.stack(w, axis=1).reshape(b_all, 3 * blk, d)

        k_win = _windows(k_loc)
        v_win = _windows(v_loc)

        # --- global tokens (shared by every block of the tile) ---------------
        gk = gk_ref[0]                                   # (ht, g, d)
        gv = gv_ref[0]
        g = gk.shape[1]
        gk_b = jnp.broadcast_to(gk[:, None], (ht, bt, g, d)).reshape(b_all, g, d)
        gv_b = jnp.broadcast_to(gv[:, None], (ht, bt, g, d)).reshape(b_all, g, d)

        parts_k = [gk_b]
        parts_v = [gv_b]
        if has_sparse:
            ts = sk_ref.shape[-2]
            parts_k.append(sk_ref[0].reshape(b_all, ts, d))
            parts_v.append(sv_ref[0].reshape(b_all, ts, d))
        parts_k.append(k_win)
        parts_v.append(v_win)
        k_all = jnp.concatenate(parts_k, axis=1)         # (ht*bt, kv, d)
        v_all = jnp.concatenate(parts_v, axis=1)

        # --- additive mask (head-independent, broadcast over query rows) -----
        m = m_ref[0]                                     # (bt, 1, kv)
        kv = m.shape[-1]
        mb = jnp.broadcast_to(m[None], (ht, bt, 1, kv)).reshape(b_all, 1, kv)
        mb = mb.astype(jnp.float32)

        # --- softmax(Q K^T / sqrt(d) + mask) @ V, batched over ht*bt blocks ---
        s = jnp.einsum('bqd,bkd->bqk', q, k_all,
                       preferred_element_type=jnp.float32)
        s = s + mb
        s_max = jnp.max(s, axis=-1, keepdims=True)
        e = jnp.exp(s - s_max)
        l = jnp.sum(e, axis=-1, keepdims=True)
        # l >= 1 always (the row max contributes exp(0) = 1), so the reciprocal
        # is well defined even for windows that are fully padded by finfo.min.
        r = pl.reciprocal(l, approx=True)
        r = r * (2.0 - l * r)                            # 1 Newton step -> ~fp32

        ctx = jnp.einsum('bqk,bkd->bqd', e.astype(v_all.dtype), v_all,
                         preferred_element_type=jnp.float32)
        out = (ctx * r).astype(o_ref.dtype)
        o_ref[0] = out.reshape(ht, bt * blk, d)

    return kernel


# ----------------------------------------------------------------------------
# Tile chooser: largest (head-tile, block-tile) whose working set fits VMEM
# ----------------------------------------------------------------------------
def _choose_tiles(h, b, blk, d, g, ts, itemsize, budget=20 * 1024 * 1024):
    def divs(x):
        return [v for v in range(x, 0, -1) if x % v == 0]

    kv = g + ts + 3 * blk
    for ht in divs(h):
        for bt in divs(b):
            io = 2 * ht * bt * blk * d * itemsize            # q + out
            io += 2 * ht * (bt + 2) * blk * d * itemsize     # local k, v
            io += 2 * ht * g * d * itemsize                  # global k, v
            io += 2 * ht * bt * ts * d * itemsize            # sparse k, v
            io += bt * kv * 4                                # mask
            scratch = (2 * ht * bt * blk * kv                # scores + exp
                       + 2 * ht * bt * kv * d                # assembled K, V
                       + 2 * ht * bt * 3 * blk * d) * 4      # local windows
            if 2 * io + scratch <= budget:                   # 2x: double buffer
                return ht, bt
    return 1, 1


# ----------------------------------------------------------------------------
# pallas_call wrapper
# ----------------------------------------------------------------------------
def lsg_block_attention(q, k_loc_pad, v_loc_pad, global_k, global_v,
                        sparse_k, sparse_v, mask, *, block_size, ht, bt):
    """q: (n, h, t, d); k/v_loc_pad: (n, h, t + (bt)*blk, d) zero-padded K/V;
    global_k/v: (n, h, g, d); sparse_k/v: (n, h, b, ts, d) or None;
    mask: (n, b, 1, kv) additive.  Returns (n, h, t, d)."""
    n, h, t, d = q.shape
    blk = block_size
    b = t // blk
    g = global_k.shape[-2]
    kv = mask.shape[-1]
    has_sparse = sparse_k is not None
    scale = 1.0 / math.sqrt(d)

    kernel = _make_lsg_kernel(ht, bt, blk, has_sparse, scale)
    grid = (n, h // ht, b // bt)

    q_spec = pl.BlockSpec((1, ht, bt * blk, d), lambda i, jh, kb: (i, jh, kb, 0))
    g_spec = pl.BlockSpec((1, ht, g, d), lambda i, jh, kb: (i, jh, 0, 0))
    main_spec = pl.BlockSpec((1, ht, bt * blk, d), lambda i, jh, kb: (i, jh, kb, 0))
    halo_specs = [
        pl.BlockSpec((1, ht, blk, d),
                     lambda i, jh, kb, r=r: (i, jh, (kb + 1) * bt + r, 0))
        for r in range(2)
    ]
    m_spec = pl.BlockSpec((1, bt, 1, kv), lambda i, jh, kb: (i, kb, 0, 0))
    out_spec = pl.BlockSpec((1, ht, bt * blk, d), lambda i, jh, kb: (i, jh, kb, 0))

    in_specs = [q_spec, g_spec, g_spec]
    inputs = [q, global_k, global_v]
    if has_sparse:
        ts = sparse_k.shape[-2]
        s_spec = pl.BlockSpec((1, ht, bt, ts, d),
                              lambda i, jh, kb: (i, jh, kb, 0, 0))
        in_specs += [s_spec, s_spec]
        inputs += [sparse_k, sparse_v]
    in_specs += [main_spec] + halo_specs + [main_spec] + halo_specs + [m_spec]
    inputs += [k_loc_pad, k_loc_pad, k_loc_pad,
               v_loc_pad, v_loc_pad, v_loc_pad, mask]

    return pl.pallas_call(
        kernel,
        out_shape=jax.ShapeDtypeStruct((n, h, t, d), q.dtype),
        grid_spec=pltpu.PrefetchScalarGridSpec(
            num_scalar_prefetch=0,
            grid=grid,
            in_specs=in_specs,
            out_specs=out_spec),
        compiler_params=pltpu.CompilerParams(
            # all axes independent -> let multi-TC chips shard the whole grid
            dimension_semantics=("parallel", "parallel", "parallel"),
            # tiles are chosen for a <=20 MiB working set; 32 MiB keeps full
            # double buffering on every generation (v7x physical VMEM = 64 MiB)
            vmem_limit_bytes=32 * 1024 * 1024),
    )(*inputs)


# ----------------------------------------------------------------------------
# LSG glue (plain JAX) — mirrors the PyTorch module semantics
# ----------------------------------------------------------------------------
class LSGAttentionProduct:
    def __init__(self, block_size=8, sparse_block_size=8, sparsity_factor=4):
        self.block_size = block_size
        self.sparse_block_size = sparse_block_size
        self.sparsity_factor = sparsity_factor
        self.local_shapes = (self.block_size * 3, self.block_size)
        if self.sparse_block_size and self.sparsity_factor > 0:
            self.sparse_shapes = (self.sparse_block_size * 3,
                                  self.block_size // self.sparsity_factor)

    # --- helpers (used for the mask build and the pure-JAX reference) --------
    @staticmethod
    def _unfold_windows(x, size, step):
        # x: (..., T, d) -> (..., n_windows, size, d)
        t = x.shape[-2]
        n_windows = (t - size) // step + 1
        idx = jnp.arange(n_windows)[:, None] * step + jnp.arange(size)[None, :]
        return x[..., idx, :]

    def reshape_to_local_block(self, x, is_attn_mask=False):
        size, step = self.local_shapes
        s = (size - step) // 2
        if is_attn_mask:
            pad_value = float(jnp.finfo(x.dtype).min)
            x = jnp.swapaxes(x, -1, -2)
        else:
            pad_value = 0.0
        pad = [(0, 0)] * (x.ndim - 2) + [(s, s), (0, 0)]
        x = jnp.pad(x, pad, constant_values=pad_value)
        return self._unfold_windows(x, size, step)

    def reshape_to_sparse_block(self, x, is_attn_mask=False):
        size, step = self.sparse_shapes
        odd_offset = step % 2
        size = size * 2
        s = (size - step) // 2 + odd_offset
        if is_attn_mask:
            pad_value = float(jnp.finfo(x.dtype).min)
            x = jnp.swapaxes(x, -1, -2)
        else:
            pad_value = 0.0
        pad = [(0, 0)] * (x.ndim - 2) + [(s, s), (0, 0)]
        x = jnp.pad(x, pad, constant_values=pad_value)
        x = self._unfold_windows(x, size, step)
        if odd_offset:
            x = x[..., :-1, :, :]
        u = (size - self.block_size * 3 // self.sparsity_factor) // 2 + odd_offset
        sb = self.sparse_block_size
        u_ = u + odd_offset
        win = x.shape[-2]
        left = x[..., u - sb:u, :]
        right = x[..., win - u_:win - u_ + sb, :]
        return jnp.concatenate([left, right], axis=-2)

    @staticmethod
    def cat_global_sparse_local_tokens(x_global, x_sparse=None, x_local=None):
        n, h, b, t, d = x_local.shape
        xg = jnp.broadcast_to(
            x_global[:, :, None, :, :],
            (x_global.shape[0], x_global.shape[1], b,
             x_global.shape[2], x_global.shape[3]))
        parts = [xg]
        if x_sparse is not None:
            parts.append(x_sparse)
        parts.append(x_local)
        return jnp.concatenate(parts, axis=-2)

    def build_lsg_inputs(self, hidden_states, sparse_hidden_states,
                         global_hidden_states, is_attn_mask=False):
        local = self.reshape_to_local_block(hidden_states, is_attn_mask)
        sparse = None
        if sparse_hidden_states is not None:
            sparse = self.reshape_to_sparse_block(sparse_hidden_states, is_attn_mask)
        return self.cat_global_sparse_local_tokens(global_hidden_states, sparse, local)

    @staticmethod
    def chunk(x, n_blocks):
        t, d = x.shape[-2:]
        return x.reshape(*x.shape[:-2], n_blocks, t // n_blocks, d)

    # --- forward --------------------------------------------------------------
    def __call__(self, query_layer, key_layer, value_layer, attention_mask=None,
                 sparse_key=None, sparse_value=None, sparse_mask=None,
                 global_key=None, global_value=None, global_mask=None):
        n, h, t, d = query_layer.shape
        blk = self.block_size
        assert t % blk == 0
        b = t // blk
        has_sparse = sparse_key is not None
        g = global_key.shape[-2]

        # Small tensors: sparse per-block windows + additive mask are built
        # with plain JAX (exactly the PyTorch construction).  The heavy local
        # K/V is NOT expanded 3x in HBM — the kernel builds each block's
        # 3-block window from a lightly padded copy of the original K/V.
        # TODO(synk): also assemble the sparse windows in-kernel to remove the
        # remaining (small) sparse duplication.
        sparse_k = self.reshape_to_sparse_block(sparse_key) if has_sparse else None
        sparse_v = self.reshape_to_sparse_block(sparse_value) if has_sparse else None

        mask = self.build_lsg_inputs(
            attention_mask, sparse_mask, jnp.swapaxes(global_mask, -1, -2),
            is_attn_mask=True)
        mask = jnp.swapaxes(mask, -1, -2)[:, 0]              # (n, b, 1, kv)

        ts = sparse_k.shape[-2] if has_sparse else 0
        ht, bt = _choose_tiles(h, b, blk, d, g, ts, query_layer.dtype.itemsize)

        # one zero block in front (left context of block 0) and bt-1 zero blocks
        # at the back so the main/halo BlockSpec tiles always stay in range
        pad_end = max(bt - 1, 1)
        pad_cfg = [(0, 0), (0, 0), (blk, pad_end * blk), (0, 0)]
        k_loc_pad = jnp.pad(key_layer, pad_cfg)
        v_loc_pad = jnp.pad(value_layer, pad_cfg)

        return lsg_block_attention(
            query_layer, k_loc_pad, v_loc_pad, global_key, global_value,
            sparse_k, sparse_v, mask, block_size=blk, ht=ht, bt=bt)


# ----------------------------------------------------------------------------
# Pure-JAX reference (same math, duplicated-KV build path) for correctness
# ----------------------------------------------------------------------------
def _reference(q, k, v, mask):
    d = q.shape[-1]
    scores = jnp.einsum("nhbqd,nhbkd->nhbqk", q, k) / math.sqrt(d)
    scores = scores + mask[:, None, :, :, :]                 # (n,1,b,1,kv)
    probs = jax.nn.softmax(scores, axis=-1)
    return jnp.einsum("nhbqk,nhbkd->nhbqd", probs, v)


# ----------------------------------------------------------------------------
if __name__ == "__main__":
    # small, module-consistent shapes
    n, h, t, d = 2, 2, 32, 32
    block_size, sparse_block_size, sparsity_factor = 8, 8, 4
    n_global = 8
    t_sparse = t // sparsity_factor

    key = jax.random.PRNGKey(0)
    ks = jax.random.split(key, 8)
    f32 = jnp.float32

    query = jax.random.normal(ks[0], (n, h, t, d), dtype=f32)
    key_l = jax.random.normal(ks[1], (n, h, t, d), dtype=f32)
    value = jax.random.normal(ks[2], (n, h, t, d), dtype=f32)
    sparse_key = jax.random.normal(ks[3], (n, h, t_sparse, d), dtype=f32)
    sparse_value = jax.random.normal(ks[4], (n, h, t_sparse, d), dtype=f32)
    global_key = jax.random.normal(ks[5], (n, h, n_global, d), dtype=f32)
    global_value = jax.random.normal(ks[6], (n, h, n_global, d), dtype=f32)

    # additive masks: 0 = keep (all tokens valid); LSG padding adds finfo.min
    attention_mask = jnp.zeros((n, 1, 1, t), dtype=f32)
    sparse_mask = jnp.zeros((n, 1, 1, t_sparse), dtype=f32)
    global_mask = jnp.zeros((n, 1, 1, n_global), dtype=f32)

    module = LSGAttentionProduct(block_size=block_size,
                                 sparse_block_size=sparse_block_size,
                                 sparsity_factor=sparsity_factor)

    out = module(query, key_l, value,
                 attention_mask=attention_mask,
                 sparse_key=sparse_key, sparse_value=sparse_value,
                 sparse_mask=sparse_mask,
                 global_key=global_key, global_value=global_value,
                 global_mask=global_mask)
    out = jax.block_until_ready(out)
    assert out.shape == (n, h, t, d), out.shape

    # correctness check vs plain-JAX reference of the full LSG construction
    n_blocks = t // block_size
    k_built = module.build_lsg_inputs(key_l, sparse_key, global_key)
    v_built = module.build_lsg_inputs(value, sparse_value, global_value)
    m_built = jnp.swapaxes(
        module.build_lsg_inputs(attention_mask, sparse_mask,
                                jnp.swapaxes(global_mask, -1, -2),
                                is_attn_mask=True), -1, -2)[:, 0]
    q_chunk = module.chunk(query, n_blocks)
    ref = _reference(q_chunk, k_built, v_built, m_built).reshape(n, h, t, d)

    assert jnp.allclose(out, ref, atol=2e-4, rtol=2e-4), \
        float(jnp.max(jnp.abs(out - ref)))

    print("KERNEL_OK")
</pallas_src>

<mosaic_0001>
module attributes {stable_mosaic.version = 11 : i64} {
  func.func @kernel(%arg0: i32, %arg1: i32, %arg2: i32, %arg3: memref<1x2x32x32xf32, #tpu.memory_space<vmem>>, %arg4: memref<1x2x8x32xf32, #tpu.memory_space<vmem>>, %arg5: memref<1x2x8x32xf32, #tpu.memory_space<vmem>>, %arg6: memref<1x2x4x16x32xf32, #tpu.memory_space<vmem>>, %arg7: memref<1x2x4x16x32xf32, #tpu.memory_space<vmem>>, %arg8: memref<1x2x32x32xf32, #tpu.memory_space<vmem>>, %arg9: memref<1x2x8x32xf32, #tpu.memory_space<vmem>>, %arg10: memref<1x2x8x32xf32, #tpu.memory_space<vmem>>, %arg11: memref<1x2x32x32xf32, #tpu.memory_space<vmem>>, %arg12: memref<1x2x8x32xf32, #tpu.memory_space<vmem>>, %arg13: memref<1x2x8x32xf32, #tpu.memory_space<vmem>>, %arg14: memref<1x4x1x48xf32, #tpu.memory_space<vmem>>, %arg15: memref<1x2x32x32xf32, #tpu.memory_space<vmem>>) attributes {dimension_semantics = [#tpu.dimension_semantics<parallel>, #tpu.dimension_semantics<parallel>, #tpu.dimension_semantics<parallel>], iteration_bounds = array<i64: 2, 1, 1>, scalar_prefetch = 0 : i64, scratch_operands = 0 : i64, tpu.core_type = #tpu.core_type<tc>, window_params = [{transform_indices = @transform_0, window_bounds = array<i64: 1, 2, 32, 32>}, {transform_indices = @transform_1, window_bounds = array<i64: 1, 2, 8, 32>}, {transform_indices = @transform_2, window_bounds = array<i64: 1, 2, 8, 32>}, {transform_indices = @transform_3, window_bounds = array<i64: 1, 2, 4, 16, 32>}, {transform_indices = @transform_4, window_bounds = array<i64: 1, 2, 4, 16, 32>}, {transform_indices = @transform_5, window_bounds = array<i64: 1, 2, 32, 32>}, {transform_indices = @transform_6, window_bounds = array<i64: 1, 2, 8, 32>}, {transform_indices = @transform_7, window_bounds = array<i64: 1, 2, 8, 32>}, {transform_indices = @transform_8, window_bounds = array<i64: 1, 2, 32, 32>}, {transform_indices = @transform_9, window_bounds = array<i64: 1, 2, 8, 32>}, {transform_indices = @transform_10, window_bounds = array<i64: 1, 2, 8, 32>}, {transform_indices = @transform_11, window_bounds = array<i64: 1, 4, 1, 48>}, {transform_indices = @transform_12, window_bounds = array<i64: 1, 2, 32, 32>}]} {
    %c0 = arith.constant 0 : index
    %c0_0 = arith.constant 0 : index
    %c0_1 = arith.constant 0 : index
    %c0_2 = arith.constant 0 : index
    %0 = vector.load %arg3[%c0, %c0_0, %c0_1, %c0_2] : memref<1x2x32x32xf32, #tpu.memory_space<vmem>>, vector<1x2x32x32xf32>
    %1 = vector.shape_cast %0 : vector<1x2x32x32xf32> to vector<2x32x32xf32>
    %2 = vector.shape_cast %1 : vector<2x32x32xf32> to vector<8x8x32xf32>
    %cst = arith.constant 0.176776692 : f32
    %3 = vector.broadcast %cst : f32 to vector<8x8x32xf32>
    %4 = arith.mulf %2, %3 : vector<8x8x32xf32>
    %c0_3 = arith.constant 0 : index
    %c0_4 = arith.constant 0 : index
    %c0_5 = arith.constant 0 : index
    %c0_6 = arith.constant 0 : index
    %5 = vector.load %arg8[%c0_3, %c0_4, %c0_5, %c0_6] : memref<1x2x32x32xf32, #tpu.memory_space<vmem>>, vector<1x2x32x32xf32>
    %6 = vector.shape_cast %5 : vector<1x2x32x32xf32> to vector<2x32x32xf32>
    %c0_7 = arith.constant 0 : index
    %c0_8 = arith.constant 0 : index
    %c0_9 = arith.constant 0 : index
    %c0_10 = arith.constant 0 : index
    %7 = vector.load %arg9[%c0_7, %c0_8, %c0_9, %c0_10] : memref<1x2x8x32xf32, #tpu.memory_space<vmem>>, vector<1x2x8x32xf32>
    %8 = vector.shape_cast %7 : vector<1x2x8x32xf32> to vector<2x8x32xf32>
    %c0_11 = arith.constant 0 : index
    %c0_12 = arith.constant 0 : index
    %c0_13 = arith.constant 0 : index
    %c0_14 = arith.constant 0 : index
    %9 = vector.load %arg10[%c0_11, %c0_12, %c0_13, %c0_14] : memref<1x2x8x32xf32, #tpu.memory_space<vmem>>, vector<1x2x8x32xf32>
    %10 = vector.shape_cast %9 : vector<1x2x8x32xf32> to vector<2x8x32xf32>
    %11 = tpu.concatenate %6, %8, %10 in 1 : vector<2x32x32xf32>, vector<2x8x32xf32>, vector<2x8x32xf32> -> vector<2x48x32xf32>
    %c0_15 = arith.constant 0 : index
    %c0_16 = arith.constant 0 : index
    %c0_17 = arith.constant 0 : index
    %c0_18 = arith.constant 0 : index
    %12 = vector.load %arg11[%c0_15, %c0_16, %c0_17, %c0_18] : memref<1x2x32x32xf32, #tpu.memory_space<vmem>>, vector<1x2x32x32xf32>
    %13 = vector.shape_cast %12 : vector<1x2x32x32xf32> to vector<2x32x32xf32>
    %c0_19 = arith.constant 0 : index
    %c0_20 = arith.constant 0 : index
    %c0_21 = arith.constant 0 : index
    %c0_22 = arith.constant 0 : index
    %14 = vector.load %arg12[%c0_19, %c0_20, %c0_21, %c0_22] : memref<1x2x8x32xf32, #tpu.memory_space<vmem>>, vector<1x2x8x32xf32>
    %15 = vector.shape_cast %14 : vector<1x2x8x32xf32> to vector<2x8x32xf32>
    %c0_23 = arith.constant 0 : index
    %c0_24 = arith.constant 0 : index
    %c0_25 = arith.constant 0 : index
    %c0_26 = arith.constant 0 : index
    %16 = vector.load %arg13[%c0_23, %c0_24, %c0_25, %c0_26] : memref<1x2x8x32xf32, #tpu.memory_space<vmem>>, vector<1x2x8x32xf32>
    %17 = vector.shape_cast %16 : vector<1x2x8x32xf32> to vector<2x8x32xf32>
    %18 = tpu.concatenate %13, %15, %17 in 1 : vector<2x32x32xf32>, vector<2x8x32xf32>, vector<2x8x32xf32> -> vector<2x48x32xf32>
    %19 = vector.extract_strided_slice %11 {offsets = [0, 0, 0], sizes = [2, 24, 32], strides = [1, 1, 1]} : vector<2x48x32xf32> to vector<2x24x32xf32>
    %20 = vector.extract_strided_slice %11 {offsets = [0, 8, 0], sizes = [2, 24, 32], strides = [1, 1, 1]} : vector<2x48x32xf32> to vector<2x24x32xf32>
    %21 = vector.extract_strided_slice %11 {offsets = [0, 16, 0], sizes = [2, 24, 32], strides = [1, 1, 1]} : vector<2x48x32xf32> to vector<2x24x32xf32>
    %22 = vector.extract_strided_slice %11 {offsets = [0, 24, 0], sizes = [2, 24, 32], strides = [1, 1, 1]} : vector<2x48x32xf32> to vector<2x24x32xf32>
    %23 = vector.shape_cast %19 : vector<2x24x32xf32> to vector<2x1x24x32xf32>
    %24 = vector.shape_cast %20 : vector<2x24x32xf32> to vector<2x1x24x32xf32>
    %25 = vector.shape_cast %21 : vector<2x24x32xf32> to vector<2x1x24x32xf32>
    %26 = vector.shape_cast %22 : vector<2x24x32xf32> to vector<2x1x24x32xf32>
    %27 = tpu.concatenate %23, %24, %25, %26 in 1 : vector<2x1x24x32xf32>, vector<2x1x24x32xf32>, vector<2x1x24x32xf32>, vector<2x1x24x32xf32> -> vector<2x4x24x32xf32>
    %28 = vector.shape_cast %27 : vector<2x4x24x32xf32> to vector<8x24x32xf32>
    %29 = vector.extract_strided_slice %18 {offsets = [0, 0, 0], sizes = [2, 24, 32], strides = [1, 1, 1]} : vector<2x48x32xf32> to vector<2x24x32xf32>
    %30 = vector.extract_strided_slice %18 {offsets = [0, 8, 0], sizes = [2, 24, 32], strides = [1, 1, 1]} : vector<2x48x32xf32> to vector<2x24x32xf32>
    %31 = vector.extract_strided_slice %18 {offsets = [0, 16, 0], sizes = [2, 24, 32], strides = [1, 1, 1]} : vector<2x48x32xf32> to vector<2x24x32xf32>
    %32 = vector.extract_strided_slice %18 {offsets = [0, 24, 0], sizes = [2, 24, 32], strides = [1, 1, 1]} : vector<2x48x32xf32> to vector<2x24x32xf32>
    %33 = vector.shape_cast %29 : vector<2x24x32xf32> to vector<2x1x24x32xf32>
    %34 = vector.shape_cast %30 : vector<2x24x32xf32> to vector<2x1x24x32xf32>
    %35 = vector.shape_cast %31 : vector<2x24x32xf32> to vector<2x1x24x32xf32>
    %36 = vector.shape_cast %32 : vector<2x24x32xf32> to vector<2x1x24x32xf32>
    %37 = tpu.concatenate %33, %34, %35, %36 in 1 : vector<2x1x24x32xf32>, vector<2x1x24x32xf32>, vector<2x1x24x32xf32>, vector<2x1x24x32xf32> -> vector<2x4x24x32xf32>
    %38 = vector.shape_cast %37 : vector<2x4x24x32xf32> to vector<8x24x32xf32>
    %c0_27 = arith.constant 0 : index
    %c0_28 = arith.constant 0 : index
    %c0_29 = arith.constant 0 : index
    %c0_30 = arith.constant 0 : index
    %39 = vector.load %arg4[%c0_27, %c0_28, %c0_29, %c0_30] : memref<1x2x8x32xf32, #tpu.memory_space<vmem>>, vector<1x2x8x32xf32>
    %40 = vector.shape_cast %39 : vector<1x2x8x32xf32> to vector<2x8x32xf32>
    %c0_31 = arith.constant 0 : index
    %c0_32 = arith.constant 0 : index
    %c0_33 = arith.constant 0 : index
    %c0_34 = arith.constant 0 : index
    %41 = vector.load %arg5[%c0_31, %c0_32, %c0_33, %c0_34] : memref<1x2x8x32xf32, #tpu.memory_space<vmem>>, vector<1x2x8x32xf32>
    %42 = vector.shape_cast %41 : vector<1x2x8x32xf32> to vector<2x8x32xf32>
    %43 = vector.shape_cast %40 : vector<2x8x32xf32> to vector<2x1x8x32xf32>
    %44 = vector.shape_cast %43 : vector<2x1x8x32xf32> to vector<2x1x8x32xf32>
    %45 = vector.broadcast %44 : vector<2x1x8x32xf32> to vector<2x4x8x32xf32>
    %46 = vector.shape_cast %45 : vector<2x4x8x32xf32> to vector<8x8x32xf32>
    %47 = vector.shape_cast %42 : vector<2x8x32xf32> to vector<2x1x8x32xf32>
    %48 = vector.shape_cast %47 : vector<2x1x8x32xf32> to vector<2x1x8x32xf32>
    %49 = vector.broadcast %48 : vector<2x1x8x32xf32> to vector<2x4x8x32xf32>
    %50 = vector.shape_cast %49 : vector<2x4x8x32xf32> to vector<8x8x32xf32>
    %c0_35 = arith.constant 0 : index
    %c0_36 = arith.constant 0 : index
    %c0_37 = arith.constant 0 : index
    %c0_38 = arith.constant 0 : index
    %c0_39 = arith.constant 0 : index
    %51 = vector.load %arg6[%c0_35, %c0_36, %c0_37, %c0_38, %c0_39] : memref<1x2x4x16x32xf32, #tpu.memory_space<vmem>>, vector<1x2x4x16x32xf32>
    %52 = vector.shape_cast %51 : vector<1x2x4x16x32xf32> to vector<2x4x16x32xf32>
    %53 = vector.shape_cast %52 : vector<2x4x16x32xf32> to vector<8x16x32xf32>
    %c0_40 = arith.constant 0 : index
    %c0_41 = arith.constant 0 : index
    %c0_42 = arith.constant 0 : index
    %c0_43 = arith.constant 0 : index
    %c0_44 = arith.constant 0 : index
    %54 = vector.load %arg7[%c0_40, %c0_41, %c0_42, %c0_43, %c0_44] : memref<1x2x4x16x32xf32, #tpu.memory_space<vmem>>, vector<1x2x4x16x32xf32>
    %55 = vector.shape_cast %54 : vector<1x2x4x16x32xf32> to vector<2x4x16x32xf32>
    %56 = vector.shape_cast %55 : vector<2x4x16x32xf32> to vector<8x16x32xf32>
    %57 = tpu.concatenate %46, %53, %28 in 1 : vector<8x8x32xf32>, vector<8x16x32xf32>, vector<8x24x32xf32> -> vector<8x48x32xf32>
    %58 = tpu.concatenate %50, %56, %38 in 1 : vector<8x8x32xf32>, vector<8x16x32xf32>, vector<8x24x32xf32> -> vector<8x48x32xf32>
    %c0_45 = arith.constant 0 : index
    %c0_46 = arith.constant 0 : index
    %c0_47 = arith.constant 0 : index
    %c0_48 = arith.constant 0 : index
    %59 = vector.load %arg14[%c0_45, %c0_46, %c0_47, %c0_48] : memref<1x4x1x48xf32, #tpu.memory_space<vmem>>, vector<1x4x1x48xf32>
    %60 = vector.shape_cast %59 : vector<1x4x1x48xf32> to vector<4x1x48xf32>
    %61 = vector.shape_cast %60 : vector<4x1x48xf32> to vector<1x4x1x48xf32>
    %62 = vector.shape_cast %61 : vector<1x4x1x48xf32> to vector<1x4x1x48xf32>
    %63 = vector.broadcast %62 : vector<1x4x1x48xf32> to vector<2x4x1x48xf32>
    %64 = vector.shape_cast %63 : vector<2x4x1x48xf32> to vector<8x1x48xf32>
    "tpu.trace_start"() <{level = 10 : i32, message = "bqd,bkd->bqk"}> : () -> ()
    %cst_49 = arith.constant dense<0.000000e+00> : vector<8x8x48xf32>
    %65 = tpu.matmul %4, %57, %cst_49 {dimension_numbers = #tpu.dot_dimension_numbers<[2], [2], [1], [1], [0, 0, 0, 1, 1, 1], [0], [0]>} : vector<8x8x32xf32>, vector<8x48x32xf32>, vector<8x8x48xf32> -> vector<8x8x48xf32>
    "tpu.trace_stop"() : () -> ()
    %66 = vector.broadcast %64 : vector<8x1x48xf32> to vector<8x8x48xf32>
    %67 = arith.addf %65, %66 : vector<8x8x48xf32>
    %cst_50 = arith.constant dense<0xFF800000> : vector<8x8xf32>
    %68 = vector.multi_reduction <maximumf>, %67, %cst_50 [2] : vector<8x8x48xf32> to vector<8x8xf32>
    %69 = vector.shape_cast %68 : vector<8x8xf32> to vector<8x8x1xf32>
    %70 = vector.broadcast %69 : vector<8x8x1xf32> to vector<8x8x48xf32>
    %71 = arith.subf %67, %70 : vector<8x8x48xf32>
    %72 = math.exp %71 : vector<8x8x48xf32>
    %cst_51 = arith.constant dense<0.000000e+00> : vector<8x8xf32>
    %73 = vector.multi_reduction <add>, %72, %cst_51 [2] : vector<8x8x48xf32> to vector<8x8xf32>
    %74 = vector.shape_cast %73 : vector<8x8xf32> to vector<8x8x1xf32>
    %75 = tpu.reciprocal %74 {approx = true} : vector<8x8x1xf32> -> vector<8x8x1xf32>
    %76 = arith.mulf %74, %75 : vector<8x8x1xf32>
    %cst_52 = arith.constant 2.000000e+00 : f32
    %77 = vector.broadcast %cst_52 : f32 to vector<8x8x1xf32>
    %78 = arith.subf %77, %76 : vector<8x8x1xf32>
    %79 = arith.mulf %75, %78 : vector<8x8x1xf32>
    "tpu.trace_start"() <{level = 10 : i32, message = "bqk,bkd->bqd"}> : () -> ()
    %cst_53 = arith.constant dense<0.000000e+00> : vector<8x8x32xf32>
    %80 = tpu.matmul %72, %58, %cst_53 {dimension_numbers = #tpu.dot_dimension_numbers<[2], [1], [1], [2], [0, 0, 0, 1, 1, 2], [0], [0]>} : vector<8x8x48xf32>, vector<8x48x32xf32>, vector<8x8x32xf32> -> vector<8x8x32xf32>
    "tpu.trace_stop"() : () -> ()
    %81 = vector.broadcast %79 : vector<8x8x1xf32> to vector<8x8x32xf32>
    %82 = arith.mulf %80, %81 : vector<8x8x32xf32>
    %83 = vector.shape_cast %82 : vector<8x8x32xf32> to vector<2x32x32xf32>
    %c0_54 = arith.constant 0 : index
    %c0_55 = arith.constant 0 : index
    %c0_56 = arith.constant 0 : index
    %c0_57 = arith.constant 0 : index
    %84 = vector.load %arg15[%c0_54, %c0_55, %c0_56, %c0_57] : memref<1x2x32x32xf32, #tpu.memory_space<vmem>>, vector<1x2x32x32xf32>
    %85 = vector.shape_cast %84 : vector<1x2x32x32xf32> to vector<2x32x32xf32>
    %86 = vector.shape_cast %83 : vector<2x32x32xf32> to vector<1x2x32x32xf32>
    tpu.vector_store %arg15[%c0_54, %c0_55, %c0_56, %c0_57], %86 {strides = array<i32>} : memref<1x2x32x32xf32, #tpu.memory_space<vmem>>, vector<1x2x32x32xf32>,
    return
  }
  func.func @transform_0(%arg0: i32, %arg1: i32, %arg2: i32) -> (i32, i32, i32, i32) {
    %c0_i32 = arith.constant 0 : i32
    %c0_i32_0 = arith.constant 0 : i32
    return %arg0, %arg1, %arg2, %c0_i32 : i32, i32, i32, i32
  }
  func.func @transform_1(%arg0: i32, %arg1: i32, %arg2: i32) -> (i32, i32, i32, i32) {
    %c0_i32 = arith.constant 0 : i32
    %c0_i32_0 = arith.constant 0 : i32
    %c0_i32_1 = arith.constant 0 : i32
    return %arg0, %arg1, %c0_i32, %c0_i32_0 : i32, i32, i32, i32
  }
  func.func @transform_2(%arg0: i32, %arg1: i32, %arg2: i32) -> (i32, i32, i32, i32) {
    %c0_i32 = arith.constant 0 : i32
    %c0_i32_0 = arith.constant 0 : i32
    %c0_i32_1 = arith.constant 0 : i32
    return %arg0, %arg1, %c0_i32, %c0_i32_0 : i32, i32, i32, i32
  }
  func.func @transform_3(%arg0: i32, %arg1: i32, %arg2: i32) -> (i32, i32, i32, i32, i32) {
    %c0_i32 = arith.constant 0 : i32
    %c0_i32_0 = arith.constant 0 : i32
    %c0_i32_1 = arith.constant 0 : i32
    return %arg0, %arg1, %arg2, %c0_i32, %c0_i32_0 : i32, i32, i32, i32, i32
  }
  func.func @transform_4(%arg0: i32, %arg1: i32, %arg2: i32) -> (i32, i32, i32, i32, i32) {
    %c0_i32 = arith.constant 0 : i32
    %c0_i32_0 = arith.constant 0 : i32
    %c0_i32_1 = arith.constant 0 : i32
    return %arg0, %arg1, %arg2, %c0_i32, %c0_i32_0 : i32, i32, i32, i32, i32
  }
  func.func @transform_5(%arg0: i32, %arg1: i32, %arg2: i32) -> (i32, i32, i32, i32) {
    %c0_i32 = arith.constant 0 : i32
    %c0_i32_0 = arith.constant 0 : i32
    return %arg0, %arg1, %arg2, %c0_i32 : i32, i32, i32, i32
  }
  func.func @transform_6(%arg0: i32, %arg1: i32, %arg2: i32) -> (i32, i32, i32, i32) {
    %c1_i32 = arith.constant 1 : i32
    %0 = arith.addi %arg2, %c1_i32 : i32
    %c4_i32 = arith.constant 4 : i32
    %1 = arith.muli %0, %c4_i32 : i32
    %c0_i32 = arith.constant 0 : i32
    %2 = arith.addi %1, %c0_i32 : i32
    %c0_i32_0 = arith.constant 0 : i32
    %c0_i32_1 = arith.constant 0 : i32
    return %arg0, %arg1, %2, %c0_i32_0 : i32, i32, i32, i32
  }
  func.func @transform_7(%arg0: i32, %arg1: i32, %arg2: i32) -> (i32, i32, i32, i32) {
    %c1_i32 = arith.constant 1 : i32
    %0 = arith.addi %arg2, %c1_i32 : i32
    %c4_i32 = arith.constant 4 : i32
    %1 = arith.muli %0, %c4_i32 : i32
    %c1_i32_0 = arith.constant 1 : i32
    %2 = arith.addi %1, %c1_i32_0 : i32
    %c0_i32 = arith.constant 0 : i32
    %c0_i32_1 = arith.constant 0 : i32
    return %arg0, %arg1, %2, %c0_i32 : i32, i32, i32, i32
  }
  func.func @transform_8(%arg0: i32, %arg1: i32, %arg2: i32) -> (i32, i32, i32, i32) {
    %c0_i32 = arith.constant 0 : i32
    %c0_i32_0 = arith.constant 0 : i32
    return %arg0, %arg1, %arg2, %c0_i32 : i32, i32, i32, i32
  }
  func.func @transform_9(%arg0: i32, %arg1: i32, %arg2: i32) -> (i32, i32, i32, i32) {
    %c1_i32 = arith.constant 1 : i32
    %0 = arith.addi %arg2, %c1_i32 : i32
    %c4_i32 = arith.constant 4 : i32
    %1 = arith.muli %0, %c4_i32 : i32
    %c0_i32 = arith.constant 0 : i32
    %2 = arith.addi %1, %c0_i32 : i32
    %c0_i32_0 = arith.constant 0 : i32
    %c0_i32_1 = arith.constant 0 : i32
    return %arg0, %arg1, %2, %c0_i32_0 : i32, i32, i32, i32
  }
  func.func @transform_10(%arg0: i32, %arg1: i32, %arg2: i32) -> (i32, i32, i32, i32) {
    %c1_i32 = arith.constant 1 : i32
    %0 = arith.addi %arg2, %c1_i32 : i32
    %c4_i32 = arith.constant 4 : i32
    %1 = arith.muli %0, %c4_i32 : i32
    %c1_i32_0 = arith.constant 1 : i32
    %2 = arith.addi %1, %c1_i32_0 : i32
    %c0_i32 = arith.constant 0 : i32
    %c0_i32_1 = arith.constant 0 : i32
    return %arg0, %arg1, %2, %c0_i32 : i32, i32, i32, i32
  }
  func.func @transform_11(%arg0: i32, %arg1: i32, %arg2: i32) -> (i32, i32, i32, i32) {
    %c0_i32 = arith.constant 0 : i32
    %c0_i32_0 = arith.constant 0 : i32
    %c0_i32_1 = arith.constant 0 : i32
    return %arg0, %arg2, %c0_i32, %c0_i32_0 : i32, i32, i32, i32
  }
  func.func @transform_12(%arg0: i32, %arg1: i32, %arg2: i32) -> (i32, i32, i32, i32) {
    %c0_i32 = arith.constant 0 : i32
    %c0_i32_0 = arith.constant 0 : i32
    return %arg0, %arg1, %arg2, %c0_i32 : i32, i32, i32, i32
  }
}

</mosaic_0001>

<bundles_post_ra>
// kernel: tpu_custom_call.1
= control target key start
LH: loop header
LB: loop body
LE: loop exit
PB: predicated region body
PF: predicated region fallthrough
CT: control target
= control target key end

     0   :  { %s3019_s0 = inlined_call_operand.vmem [shape: f32[2,2,32,32], index: 0, kind: input, shape index: {}]   ;;  %s3020_s1 = inlined_call_operand.vmem [shape: f32[2,2,8,32], index: 1, kind: input, shape index: {}]   ;;  %s3021_s2 = inlined_call_operand.vmem [shape: f32[2,2,8,32], index: 2, kind: input, shape index: {}]   ;;  %s3022_s3 = inlined_call_operand.vmem [shape: f32[2,2,4,16,32], index: 3, kind: input, shape index: {}]   ;;  %s3023_s4 = inlined_call_operand.vmem [shape: f32[2,2,4,16,32], index: 4, kind: input, shape index: {}]   ;;  %s3024_s5 = inlined_call_operand.vmem [shape: f32[2,2,64,32], index: 5, kind: input, shape index: {}]   ;;  %s3025_s6 = inlined_call_operand.vmem [shape: f32[2,2,64,32], index: 6, kind: input, shape index: {}]   ;;  %s3026_s7 = inlined_call_operand.vmem [shape: f32[2,2,64,32], index: 7, kind: input, shape index: {}]   ;;  %s3027_s8 = inlined_call_operand.vmem [shape: f32[2,2,64,32], index: 8, kind: input, shape index: {}]   ;;  %s3028_s9 = inlined_call_operand.vmem [shape: f32[2,2,64,32], index: 9, kind: input, shape index: {}]   ;;  %s3029_s10 = inlined_call_operand.vmem [shape: f32[2,2,64,32], index: 10, kind: input, shape index: {}]   ;;  %s3030_s11 = inlined_call_operand.vmem [shape: f32[2,4,1,48], index: 11, kind: input, shape index: {}]   ;;  %s3031_s12 = inlined_call_operand.hbm [shape: f32[2,2,32,32], index: 12, kind: output, shape index: {}]  }
   0x1   :  { %3038 = sst [smem:[#allocation15_spill]] %s3022_s3 }
   0x2   :  { %3039 = sst [smem:[#allocation16_spill]] %s3024_s5 }
   0x3   :  { %3040 = sst [smem:[#allocation17_spill]] %s3025_s6 }
   0x4   :  { %3041 = sst [smem:[#allocation18_spill]] %s3026_s7 }
   0x5   :  { %3042 = sst [smem:[#allocation19_spill]] %s3027_s8 }
   0x6   :  { %3043 = sst [smem:[#allocation20_spill]] %s3028_s9 }
   0x7   :  { %17 = vsyncpa [#allocation9], 0 }
   0x8   :  { %19 = vsyncpa [#allocation9 + $0x1], 0  ;;  %s2599_s21 = smov 0   ;;  %s2601_s22 = smov 0  }
   0x9   :  { %s2603_s23 = smov 0   ;;  %s2605_s24 = smov 0  }
   0xa   :  { %s2607_s25 = smov 0   ;;  %s2609_s26 = smov 0  }
   0xb LB: > { %3044 = sst [smem:[#allocation11_spill]] %s2510_s21  ;;  %s2229_s27 = sadd.s32 4294967295, %s2530_s26   ;;  %s2530_s26 = sphi %s2609_s26, %s25_s26   ;;  %s2526_s25 = sphi %s2607_s25, %s3070_s25   ;;  %s2522_s24 = sphi %s2605_s24, %s3069_s24   ;;  %s2518_s23 = sphi %s2603_s23, %s3068_s23   ;;  %s2514_s22 = sphi %s2601_s22, %s3067_s22   ;;  %s2510_s21 = sphi %s2599_s21, %s3066_s21  }
   0xc   : > { %s2230_s28 = sadd.s32 4294967294, %s2530_s26   ;;  %s44_s29 = sadd.s32 1, %s2526_s25 }
   0xd   : > { %s201_s30 = sadd.s32 1, %s2518_s23  ;;  %p46_p0 = scmp.ge.s32.totalorder %s44_s29, 2 }
   0xe   : > { %p208_p1 = scmp.ne.s32.totalorder %s2518_s23, %s2514_s22  ;;  %p209_p2 = scmp.eq.s32.totalorder %s2530_s26, 0 }
   0xf   : > { %p440_p3 = scmp.eq.s32.totalorder %s2229_s27, 1  ;;  %s3072_s29 = smov (%p46_p0, %s44_s29), 0 }
  0x10   : > { %3045 = sst [smem:[#allocation12_spill]] %s3072_s29  ;;  %p2638_p4 = por %p209_p2, %p208_p1 }
  0x11   : > { %p2642_p5 = por %p440_p3, %p208_p1  ;;  %s194_s15 = ssub.s32 %s2526_s25, %s3072_s29 }
  0x12   : > { %p445_p6 = scmp.ne.s32.totalorder %s2514_s22, %s2510_s21  ;;  %p199_p7 = scmp.eq.s32.totalorder %s194_s15, 0 }
  0x13   : > { %p446_p8 = scmp.eq.s32.totalorder %s2230_s28, 1  ;;  %p2232_p10 = scmp.ge.s32.totalorder %s2530_s26, 2 }
  0x14   : > { %s2651_s16 = scalar_select %p199_p7, %s2518_s23, %s201_s30  }
  0x15   : > { %p2653_p9 = por %p446_p8, %p445_p6  ;;  %462 = sbr.rel (%p2232_p10) target bundleno = 104 (0x68), region = 16 }
  0x16   : > { %3048 = sst [smem:[#allocation13_spill]] %s2651_s16 }
  0x17   : > { %s3049_s17 = scalar_select %p2653_p9, 1, 0 }
  0x19   : > { %3050 = sst [smem:[#allocation14_spill]] %s3049_s17 }
  0x1a   : > { %550 = sbr.rel (!%p2638_p4) target bundleno = 44 (0x2c), region = 40  ;;  %s552_s18 = sand.u32 (%p2638_p4), 1, %s2518_s23  }
  0x1b   : > { %s2347_s19 = sshll.u32 (%p2638_p4), %s2526_s25, 7  ;;  %s2233_s20 = sshll.u32 (%p2638_p4), %s552_s18, 6 }
  0x1c   : > { %s3051_s5 = sld [smem:[#allocation16_spill]] (%p2638_p4)  ;;  %s554_s15 = scalar_lea.vmem (%p2638_p4), [#allocation2], %s2233_s20 }
  0x22   : > { %s562_s30 = scalar_lea.vmem %s3051_s5, %s2347_s19 }
  0x23   : > { %v605_v0 = vld [vmem:[%s562_s30] sm:$0xff]  ;;  %v607_v1 = vld [vmem:[%s562_s30 + $0x8] sm:$0xff]  ;;  %v609_v2 = vld [vmem:[%s562_s30 + $0x10] sm:$0xff] }
  0x24   : > { %606 = vst [vmem:[%s554_s15] sm:$0xff] %v605_v0  ;;  %v611_v3 = vld [vmem:[%s562_s30 + $0x18] sm:$0xff]  ;;  %v613_v4 = vld [vmem:[%s562_s30 + $0x40] sm:$0xff]  ;;  %v615_v5 = vld [vmem:[%s562_s30 + $0x48] sm:$0xff] }
  0x25   : > { %608 = vst [vmem:[%s554_s15 + $0x8] sm:$0xff] %v607_v1  ;;  %v617_v6 = vld [vmem:[%s562_s30 + $0x50] sm:$0xff]  ;;  %v619_v7 = vld [vmem:[%s562_s30 + $0x58] sm:$0xff] }
  0x26   : > { %610 = vst [vmem:[%s554_s15 + $0x10] sm:$0xff] %v609_v2 }
  0x27   : > { %612 = vst [vmem:[%s554_s15 + $0x18] sm:$0xff] %v611_v3 }
  0x28   : > { %614 = vst [vmem:[%s554_s15 + $0x20] sm:$0xff] %v613_v4 }
  0x29   : > { %616 = vst [vmem:[%s554_s15 + $0x28] sm:$0xff] %v615_v5 }
  0x2a   : > { %618 = vst [vmem:[%s554_s15 + $0x30] sm:$0xff] %v617_v6 }
  0x2b   : > { %620 = vst [vmem:[%s554_s15 + $0x38] sm:$0xff] %v619_v7 }
  0x2c PF: > { %626 = sbr.rel (!%p2638_p4) target bundleno = 56 (0x38), region = 78  ;;  %s628_s18 = sand.u32 (%p2638_p4), 1, %s2518_s23  }
  0x2d   : > { %s2348_s19 = sshll.u32 (%p2638_p4), %s2526_s25, 7  ;;  %s2236_s20 = sshll.u32 (%p2638_p4), %s628_s18, 4 }
  0x2e   : > { %s3052_s6 = sld [smem:[#allocation17_spill]] (%p2638_p4)  ;;  %s630_s29 = scalar_lea.vmem (%p2638_p4), [#allocation3], %s2236_s20 }
  0x34   : > { %s1961_s5 = scalar_lea.vmem %s3052_s6, %s2348_s19 }
  0x35   : > { %v2239_v8 = vld [vmem:[%s1961_s5 + $0x20] sm:$0xff] }
  0x36   : > { %v2240_v9 = vld [vmem:[%s1961_s5 + $0x60] sm:$0xff]  ;;  %671 = vst [vmem:[%s630_s29] sm:$0xff] %v2239_v8 }
  0x37   : > { %673 = vst [vmem:[%s630_s29 + $0x8] sm:$0xff] %v2240_v9 }
  0x38 PF: > { %679 = sbr.rel (!%p2638_p4) target bundleno = 68 (0x44), region = 116  ;;  %s681_s30 = sand.u32 (%p2638_p4), 1, %s2518_s23  }
  0x39   : > { %s2349_s15 = sshll.u32 (%p2638_p4), %s2526_s25, 7  ;;  %s2241_s16 = sshll.u32 (%p2638_p4), %s681_s30, 4 }
  0x3a   : > { %s3053_s7 = sld [smem:[#allocation18_spill]] (%p2638_p4)  ;;  %s683_s19 = scalar_lea.vmem (%p2638_p4), [#allocation4], %s2241_s16 }
  0x40   : > { %s1971_s21 = scalar_lea.vmem %s3053_s7, %s2349_s15 }
  0x41   : > { %v2244_v10 = vld [vmem:[%s1971_s21 + $0x28] sm:$0xff] }
  0x42   : > { %v2245_v11 = vld [vmem:[%s1971_s21 + $0x68] sm:$0xff]  ;;  %725 = vst [vmem:[%s683_s19] sm:$0xff] %v2244_v10 }
  0x43   : > { %727 = vst [vmem:[%s683_s19 + $0x8] sm:$0xff] %v2245_v11 }
  0x44 PF: > { %733 = sbr.rel (!%p2638_p4) target bundleno = 86 (0x56), region = 154  ;;  %s735_s5 = sand.u32 (%p2638_p4), 1, %s2518_s23  }
  0x45   : > { %s2350_s29 = sshll.u32 (%p2638_p4), %s2526_s25, 7  ;;  %s2246_s20 = sshll.u32 (%p2638_p4), %s735_s5, 6 }
  0x46   : > { %s3054_s8 = sld [smem:[#allocation19_spill]] (%p2638_p4)  ;;  %s737_s21 = scalar_lea.vmem (%p2638_p4), [#allocation5], %s2246_s20 }
  0x4c   : > { %s745_s30 = scalar_lea.vmem %s3054_s8, %s2350_s29 }
  0x4d   : > { %v788_v12 = vld [vmem:[%s745_s30] sm:$0xff]  ;;  %v790_v13 = vld [vmem:[%s745_s30 + $0x8] sm:$0xff]  ;;  %v792_v14 = vld [vmem:[%s745_s30 + $0x10] sm:$0xff] }
  0x4e   : > { %789 = vst [vmem:[%s737_s21] sm:$0xff] %v788_v12  ;;  %v794_v15 = vld [vmem:[%s745_s30 + $0x18] sm:$0xff]  ;;  %v796_v16 = vld [vmem:[%s745_s30 + $0x40] sm:$0xff]  ;;  %v798_v17 = vld [vmem:[%s745_s30 + $0x48] sm:$0xff] }
  0x4f   : > { %791 = vst [vmem:[%s737_s21 + $0x8] sm:$0xff] %v790_v13  ;;  %v800_v18 = vld [vmem:[%s745_s30 + $0x50] sm:$0xff]  ;;  %v802_v19 = vld [vmem:[%s745_s30 + $0x58] sm:$0xff] }
  0x50   : > { %793 = vst [vmem:[%s737_s21 + $0x10] sm:$0xff] %v792_v14 }
  0x51   : > { %795 = vst [vmem:[%s737_s21 + $0x18] sm:$0xff] %v794_v15 }
  0x52   : > { %797 = vst [vmem:[%s737_s21 + $0x20] sm:$0xff] %v796_v16 }
  0x53   : > { %799 = vst [vmem:[%s737_s21 + $0x28] sm:$0xff] %v798_v17 }
  0x54   : > { %801 = vst [vmem:[%s737_s21 + $0x30] sm:$0xff] %v800_v18 }
  0x55   : > { %803 = vst [vmem:[%s737_s21 + $0x38] sm:$0xff] %v802_v19 }
  0x56 PF: > { %809 = sbr.rel (!%p2638_p4) target bundleno = 98 (0x62), region = 192  ;;  %s811_s16 = sand.u32 (%p2638_p4), 1, %s2518_s23  }
  0x57   : > { %s2351_s17 = sshll.u32 (%p2638_p4), %s2526_s25, 7  ;;  %s2249_s15 = sshll.u32 (%p2638_p4), %s811_s16, 4 }
  0x58   : > { %s3055_s9 = sld [smem:[#allocation20_spill]] (%p2638_p4)  ;;  %s813_s29 = scalar_lea.vmem (%p2638_p4), [#allocation6], %s2249_s15 }
  0x5e   : > { %s1990_s5 = scalar_lea.vmem %s3055_s9, %s2351_s17 }
  0x5f   : > { %v2252_v20 = vld [vmem:[%s1990_s5 + $0x20] sm:$0xff] }
  0x60   : > { %v2253_v21 = vld [vmem:[%s1990_s5 + $0x60] sm:$0xff]  ;;  %854 = vst [vmem:[%s813_s29] sm:$0xff] %v2252_v20 }
  0x61   : > { %856 = vst [vmem:[%s813_s29 + $0x8] sm:$0xff] %v2253_v21 }
  0x62 PF: > { %862 = sbr.rel (!%p2638_p4) target bundleno = 104 (0x68), region = 230  ;;  %s864_s20 = sand.u32 (%p2638_p4), 1, %s2518_s23  }
  0x63   : > { %s2352_s27 = sshll.u32 (%p2638_p4), %s2526_s25, 7  ;;  %s2254_s28 = sshll.u32 (%p2638_p4), %s864_s20, 4 }
  0x64   : > { %s2000_s16 = scalar_lea.vmem (%p2638_p4), %s3029_s10, %s2352_s27  ;;  %s866_s17 = scalar_lea.vmem (%p2638_p4), [#allocation7], %s2254_s28 }
  0x65   : > { %v2257_v22 = vld [vmem:[%s2000_s16 + $0x28] sm:$0xff] (%p2638_p4) }
  0x66   : > { %v2258_v23 = vld [vmem:[%s2000_s16 + $0x68] sm:$0xff] (%p2638_p4)  ;;  %908 = vst [vmem:[%s866_s17] sm:$0xff] (%p2638_p4), %v2257_v22 }
  0x67   : > { %910 = vst [vmem:[%s866_s17 + $0x8] sm:$0xff] %v2258_v23 }
  0x68 PF: > { %p2259_p11 = scmp.ge.s32.totalorder %s2530_s26, 1  ;;  %p927_p12 = scmp.lt.s32.totalorder %s2530_s26, 3 }
  0x6a   : > { %p928_p13 = pnand %p2259_p11, %p927_p12 }
  0x6b   : > { %s2705_s13 = sand.u32 (!%p928_p13), 1, %s2514_s22   ;;  %p1102_p0 = scmp.lt.s32.totalorder (!%p928_p13), %s2522_s24, 1 }
  0x6c   : > { %931 = sbr.rel (%p928_p13) target bundleno = 570 (0x23a), region = 272  ;;  %s2708_s15 = sshll.u32 (!%p928_p13), %s2705_s13, 6 }
  0x6d   : > { %s2712_s18 = scalar_lea.vmem (!%p928_p13), [#allocation2], %s2708_s15  ;;  %s2717_s19 = sshll.u32 (!%p928_p13), %s2705_s13, 4 }
  0x6e   : > { %s3037_s5 = scalar_lea.vmem (!%p928_p13), [#allocation3], %s2717_s19  ;;  %s3036_s29 = scalar_lea.vmem (!%p928_p13), [#allocation4], %s2717_s19 }
  0x6f   : > { %s3056_s3 = sld [smem:[#allocation15_spill]] (!%p928_p13)  ;;  %s2885_s7 = scalar_lea.vmem (!%p928_p13), [#allocation5], %s2708_s15 }
  0x71   : > { %vm1291_vm0 = vcmask 261120   ;;  %v1217_v24 = vld [vmem:[%s2712_s18 + $0x10] sm:$0xff]  ;;  %v1218_v25 = vld [vmem:[%s2712_s18 + $0x18] sm:$0xff]  ;;  %v1216_v27 = vld [vmem:[%s2712_s18 + $0x8] sm:$0xff]  ;;  %s2729_s20 = scalar_select %p1102_p0, %s2522_s24, 1  ;;  %vm1566_vm1 = vcmask 392192  }
  0x72   : > { %2278 = vmatpush.xpose.msk.msra.mxu0 %vm1291_vm0, %v1217_v24  ;;  %2285 = vmatpush.xpose.msk.msra.mxu1 %vm1291_vm0, %v1218_v25  ;;  %v1223_v26 = vld [vmem:[%s3037_s5] sm:$0xff]  ;;  %v1222_v41 = vld [vmem:[%s2712_s18 + $0x38] sm:$0xff]  ;;  %v1220_v51 = vld [vmem:[%s2712_s18 + $0x28] sm:$0xff] }
  0x73   : > { %v1225_v28 = vld [vmem:[%s3036_s29] sm:$0xff]  ;;  %2292 = vmatpush.xpose.msk.msra.mxu2 %vm1291_vm0, %v1223_v26  ;;  %s3035_s27 = sshll.u32 %s2729_s20, 7  ;;  %s2353_s16 = sshll.u32 %s2729_s20, 6 }
  0x74   : > { %2299 = vmatpush.xpose.msk.msra.mxu3 %vm1291_vm0, %v1225_v28  ;;  %v1215_v29 = vld [vmem:[%s2712_s18] sm:$0xff]  ;;  %s2277_s17 = sshll.u32 %s2729_s20, 2  ;;  %s2764_s29 = scalar_lea.vmem %s3019_s0, %s2353_s16  ;;  %v1221_v42 = vld [vmem:[%s2712_s18 + $0x30] sm:$0xff] }
  0x75   : > { %s2743_s21 = scalar_lea.vmem %s3056_s3, %s3035_s27  ;;  %s2769_s28 = scalar_lea.vmem %s3030_s11, %s2277_s17  ;;  %v1199_v38 = vld [vmem:[%s2764_s29] sm:$0xff]  ;;  %v1200_v40 = vld [vmem:[%s2764_s29 + $0x8] sm:$0xff]  ;;  %v1201_v43 = vld [vmem:[%s2764_s29 + $0x10] sm:$0xff] }
  0x76   : > { %2279 = vmatpush.xpose.msk.msra.mxu0 %vm1291_vm0, %v1216_v27  ;;  %2286 = vmatpush.xpose.msk.msra.mxu1 %vm1291_vm0, %v1217_v24  ;;  %v1244_v30 = vld [vmem:[%s2743_s21 + $0x8] sm:$0xff]  ;;  %v1246_v31 = vld [vmem:[%s2743_s21 + $0x18] sm:$0xff]  ;;  %v1243_v34 = vld [vmem:[%s2743_s21] sm:$0xff]  ;;  %s3057_s6 = sshll.u32 %s2729_s20, 4  ;;  %v1207_v44 = vmul.f32 0.17677669, %v1199_v38 }
  0x77   : > { %2293 = vmatpush.xpose.msk.msra.mxu2 %vm1291_vm0, %v1218_v25  ;;  %v1248_v32 = vld [vmem:[%s2743_s21 + $0x28] sm:$0xff]  ;;  %v1250_v33 = vld [vmem:[%s2743_s21 + $0x38] sm:$0xff]  ;;  %v1245_v35 = vld [vmem:[%s2743_s21 + $0x10] sm:$0xff]  ;;  %s2777_s9 = scalar_lea.vmem %s3020_s1, %s3057_s6  ;;  %s3058_s3 = scalar_lea.vmem [#allocation3], %s2717_s19  ;;  %v1208_v47 = vmul.f32 0.17677669, %v1200_v40 }
  0x78   : > { %2300 = vmatpush.xpose.msk.msra.mxu3 %vm1291_vm0, %v1223_v26  ;;  %v1247_v36 = vld [vmem:[%s2743_s21 + $0x20] sm:$0xff]  ;;  %v1249_v37 = vld [vmem:[%s2743_s21 + $0x30] sm:$0xff]  ;;  %v1202_v45 = vld [vmem:[%s2764_s29 + $0x18] sm:$0xff]  ;;  %v1209_v48 = vmul.f32 0.17677669, %v1201_v43  ;;  %s3059_s6 = scalar_lea.vmem [#allocation4], %s2717_s19 }
  0x79   : > { %v1239_v39 = vld [vmem:[%s2777_s9] sm:$0xff]  ;;  %v1224_v46 = vld [vmem:[%s3058_s3 + $0x8] sm:$0xff]  ;;  %v1210_v50 = vmul.f32 0.17677669, %v1202_v45  ;;  %v1253_v57 = vld [vmem:[%s2743_s21 + $0x50] sm:$0xff]  ;;  %s3060_s8 = sshll.u32 %s2729_s20, 7 }
  0x7a   : > { %2280 = vmatpush.xpose.msk.msra.mxu0 %vm1291_vm0, %v1215_v29  ;;  %2287 = vmatpush.xpose.msk.msra.mxu1 %vm1291_vm0, %v1216_v27  ;;  %v1226_v49 = vld [vmem:[%s3059_s6 + $0x8] sm:$0xff]  ;;  %v1219_v52 = vld [vmem:[%s2712_s18 + $0x20] sm:$0xff]  ;;  %v1257_v61 = vld [vmem:[%s2743_s21 + $0x70] sm:$0xff]  ;;  %s2895_s5 = scalar_lea.vmem %s3023_s4, %s3060_s8  ;;  %s3061_s27 = sshll.u32 %s2729_s20, 4 }
  0x7b   : > { %2294 = vmatpush.xpose.msk.msra.mxu2 %vm1291_vm0, %v1217_v24  ;;  %v1254_v53 = vld [vmem:[%s2743_s21 + $0x58] sm:$0xff]  ;;  %v1252_v54 = vld [vmem:[%s2743_s21 + $0x48] sm:$0xff]  ;;  %v1251_v58 = vld [vmem:[%s2743_s21 + $0x40] sm:$0xff]  ;;  %s2906_s17 = scalar_lea.vmem %s3021_s2, %s3061_s27  ;;  %s971_s20 = scalar_lea.vmem [#allocation7], %s2717_s19 }
  0x7c   : > { %2301 = vmatpush.xpose.msk.msra.mxu3 %vm1291_vm0, %v1218_v25  ;;  %v1256_v55 = vld [vmem:[%s2743_s21 + $0x68] sm:$0xff]  ;;  %v1258_v56 = vld [vmem:[%s2743_s21 + $0x78] sm:$0xff]  ;;  %v1255_v59 = vld [vmem:[%s2743_s21 + $0x60] sm:$0xff] }
  0x7d   : > { %v1204_v60 = vld [vmem:[%s2764_s29 + $0x28] sm:$0xff]  ;;  %v1203_v63 = vld [vmem:[%s2764_s29 + $0x20] sm:$0xff]  ;;  %v1205_v0 = vld [vmem:[%s2764_s29 + $0x30] sm:$0xff] }
  0x7e   : > { %2281 = vmatpush.xpose.msk.msra.mxu0 %vm1291_vm0, %v1244_v30  ;;  %2288 = vmatpush.xpose.msk.msra.mxu1 %vm1291_vm0, %v1246_v31  ;;  %v1240_v62 = vld [vmem:[%s2777_s9 + $0x8] sm:$0xff]  ;;  %v1212_v1 = vmul.f32 0.17677669, %v1204_v60  ;;  %v1206_v2 = vld [vmem:[%s2764_s29 + $0x38] sm:$0xff]  ;;  %v1211_v3 = vmul.f32 0.17677669, %v1203_v63 }
  0x7f   : > { %2295 = vmatpush.xpose.msk.msra.mxu2 %vm1291_vm0, %v1248_v32  ;;  %v1213_v4 = vmul.f32 0.17677669, %v1205_v0  ;;  %v1214_v5 = vmul.f32 0.17677669, %v1206_v2  ;;  %v2416_v6 = vld [vmem:[%s2769_s28] ss:$0 sm:$0xff] }
  0x80   : > { %2302 = vmatpush.xpose.msk.msra.mxu3 %vm1291_vm0, %v1250_v33  ;;  %v2418_v9 = vld [vmem:[%s2769_s28 + $0x1] ss:$0 sm:$0xff]  ;;  %v2417_v12 = vld [vmem:[%s2769_s28 + $0x2] ss:$0 sm:$0xff]  ;;  %v2419_v17 = vld [vmem:[%s2769_s28 + $0x3] ss:$0 sm:$0xff] }
  0x81   : > { %s964_s29 = scalar_lea.vmem [#allocation6], %s2717_s19  ;;  %v1230_v40 = vld [vmem:[%s2885_s7 + $0x18] sm:$0xff]  ;;  %v1237_v45 = vld [vmem:[%s971_s20] sm:$0xff]  ;;  %v1242_v60 = vld [vmem:[%s2906_s17 + $0x8] sm:$0xff]  ;;  %s2962_s19 = scalar_lea.vmem [#allocation8], %s2708_s15 }
  0x82   : > { %2282 = vmatpush.xpose.msk.msra.mxu0 %vm1291_vm0, %v1243_v34  ;;  %2289 = vmatpush.xpose.msk.msra.mxu1 %vm1291_vm0, %v1245_v35  ;;  %v1229_v34 = vld [vmem:[%s2885_s7 + $0x10] sm:$0xff]  ;;  %v1228_v35 = vld [vmem:[%s2885_s7 + $0x8] sm:$0xff]  ;;  %v1262_v43 = vld [vmem:[%s2895_s5 + $0x18] sm:$0xff]  ;;  %s2358_s15 = sshll.u32 %s2522_s24, 6  ;;  %s1889_s6 = sshll.u32 %s2962_s19, 4  ;;  %s1890_s6 = int_to_ptr.vmem [resolvable:$true] %s1889_s6 }
  0x83   : > { %2296 = vmatpush.xpose.msk.msra.mxu2 %vm1291_vm0, %v1247_v36  ;;  %v1227_v36 = vld [vmem:[%s2885_s7] sm:$0xff]  ;;  %v1238_v0 = vld [vmem:[%s971_s20 + $0x8] sm:$0xff]  ;;  %s1888_s3 = scalar_lea.hbm %s3031_s12, %s2358_s15  ;;  %s1872_s24 = scalar_lea.sflag [#allocation9], %s2705_s13 }
  0x84   : > { %2303 = vmatpush.xpose.msk.msra.mxu3 %vm1291_vm0, %v1249_v37  ;;  %v1260_v37 = vld [vmem:[%s2895_s5 + $0x8] sm:$0xff]  ;;  %v1235_v38 = vld [vmem:[%s964_s29] sm:$0xff] }
  0x85   : > { %v1271_v63 = vld [vmem:[%s2895_s5 + $0x60] sm:$0xff] }
  0x86   : > { %2283 = vmatpush.xpose.msk.msra.mxu0 %vm1291_vm0, %v1239_v39  ;;  %2290 = vmatpush.xpose.msk.msra.mxu1 %vm1291_vm0, %v1239_v39 }
  0x87   : > { %2297 = vmatpush.xpose.msk.msra.mxu2 %vm1291_vm0, %v1239_v39 }
  0x88   : > { %2304 = vmatpush.xpose.msk.msra.mxu3 %vm1291_vm0, %v1239_v39  ;;  %v1259_v39 = vld [vmem:[%s2895_s5] sm:$0xff] }
  0x89   : > { %2284 = vmatmul.msk.f32.vlgmr.msra.gmra.mxu0 %vm1291_vm0, %v1207_v44  ;;  %2291 = vmatmul.msk.f32.vlgmr.msra.gmra.mxu1 %vm1291_vm0, %v1208_v47  ;;  %v1263_v44 = vld [vmem:[%s2895_s5 + $0x20] sm:$0xff]  ;;  %v1266_v47 = vld [vmem:[%s2895_s5 + $0x38] sm:$0xff] }
  0x8a   : > { %2313 = vmatpush.xpose.msk.msrb.mxu1 %vm1291_vm0, %v1222_v41  ;;  %2306 = vmatpush.xpose.msk.msrb.mxu0 %vm1291_vm0, %v1221_v42 }
  0x8b   : > { %2320 = vmatpush.xpose.msk.msrb.mxu2 %vm1291_vm0, %v1224_v46  ;;  %2305 = vmatmul.msk.f32.vlgmr.msra.gmra.mxu3 %vm1291_vm0, %v1210_v50  ;;  %v1233_v50 = vld [vmem:[%s2885_s7 + $0x30] sm:$0xff] }
  0x8c   : > { %2327 = vmatpush.xpose.msk.msrb.mxu3 %vm1291_vm0, %v1226_v49  ;;  %2298 = vmatmul.msk.f32.vlgmr.msra.gmra.mxu2 %vm1291_vm0, %v1209_v48  ;;  %v1234_v48 = vld [vmem:[%s2885_s7 + $0x38] sm:$0xff]  ;;  %v1265_v49 = vld [vmem:[%s2895_s5 + $0x30] sm:$0xff] }
  0x8e   : > { %2314 = vmatpush.xpose.msk.msrb.mxu1 %vm1291_vm0, %v1221_v42  ;;  %2307 = vmatpush.xpose.msk.msrb.mxu0 %vm1291_vm0, %v1220_v51 }
  0x8f   : > { %2321 = vmatpush.xpose.msk.msrb.mxu2 %vm1291_vm0, %v1222_v41 }
  0x90   : > { %2328 = vmatpush.xpose.msk.msrb.mxu3 %vm1291_vm0, %v1224_v46  ;;  %v1261_v46 = vld [vmem:[%s2895_s5 + $0x10] sm:$0xff] }
  0x92   : > { %2315 = vmatpush.xpose.msk.msrb.mxu1 %vm1291_vm0, %v1220_v51  ;;  %2308 = vmatpush.xpose.msk.msrb.mxu0 %vm1291_vm0, %v1219_v52  ;;  %v1232_v51 = vld [vmem:[%s2885_s7 + $0x28] sm:$0xff]  ;;  %v1231_v52 = vld [vmem:[%s2885_s7 + $0x20] sm:$0xff]  ;;  %s1891_s7 = sshll.u32 %s1888_s3, 4  ;;  %s1892_s7 = int_to_ptr.hbm [resolvable:$true] %s1891_s7 }
  0x93   : > { %2322 = vmatpush.xpose.msk.msrb.mxu2 %vm1291_vm0, %v1221_v42  ;;  %v1264_v42 = vld [vmem:[%s2895_s5 + $0x28] sm:$0xff]  ;;  %s2466_s8 = sshra.s32 %s1892_s7, 4  ;;  %s2467_s8 = int_to_ptr.hbm [resolvable:$true] %s2466_s8 }
  0x94   : > { %2329 = vmatpush.xpose.msk.msrb.mxu3 %vm1291_vm0, %v1222_v41  ;;  %v1241_v41 = vld [vmem:[%s2906_s17] sm:$0xff]  ;;  %s2468_s9 = scalar_lea.hbm %s2467_s8, 64  ;;  %p2473_p4 = scmp.lt.s32.totalorder %s2467_s8, %s3031_s12 }
  0x95   : > { %p2469_p1 = scmp.ne.s32.totalorder %s2467_s8, %s2468_s9 }
  0x96   : > { %2316 = vmatpush.xpose.msk.msrb.mxu1 %vm1291_vm0, %v1254_v53  ;;  %2309 = vmatpush.xpose.msk.msrb.mxu0 %vm1291_vm0, %v1252_v54  ;;  %v1270_v53 = vld [vmem:[%s2895_s5 + $0x58] sm:$0xff] }
  0x97   : > { %2323 = vmatpush.xpose.msk.msrb.mxu2 %vm1291_vm0, %v1256_v55  ;;  %v1236_v54 = vld [vmem:[%s964_s29 + $0x8] sm:$0xff]  ;;  %p2470_p2 = pnand %p2469_p1, %p2642_p5  ;;  %s2472_s29 = scalar_lea.hbm %s3031_s12, 128 }
  0x98   : > { %2330 = vmatpush.xpose.msk.msrb.mxu3 %vm1291_vm0, %v1258_v56  ;;  %v1268_v55 = vld [vmem:[%s2895_s5 + $0x48] sm:$0xff]  ;;  %v1269_v56 = vld [vmem:[%s2895_s5 + $0x50] sm:$0xff]  ;;  %p2474_p6 = scmp.lt.s32.totalorder %s2472_s29, %s2468_s9 }
  0x99   : > { %p2471_p3 = pneg %p2470_p2 }
  0x9a   : > { %2317 = vmatpush.xpose.msk.msrb.mxu1 %vm1291_vm0, %v1253_v57  ;;  %2310 = vmatpush.xpose.msk.msrb.mxu0 %vm1291_vm0, %v1251_v58  ;;  %v1267_v58 = vld [vmem:[%s2895_s5 + $0x40] sm:$0xff]  ;;  %p2475_p7 = por %p2474_p6, %p2473_p4 }
  0x9b   : > { %2324 = vmatpush.xpose.msk.msrb.mxu2 %vm1291_vm0, %v1255_v59 }
  0x9c   : > { %2331 = vmatpush.xpose.msk.msrb.mxu3 %vm1291_vm0, %v1257_v61  ;;  %p2476_p8 = pnand %p2475_p7, %p2471_p3 }
  0x9e   : > { %2318 = vmatpush.xpose.msk.msrb.mxu1 %vm1291_vm0, %v1240_v62  ;;  %2311 = vmatpush.xpose.msk.msrb.mxu0 %vm1291_vm0, %v1240_v62 }
  0x9f   : > { %2325 = vmatpush.xpose.msk.msrb.mxu2 %vm1291_vm0, %v1240_v62 }
  0xa0   : > { %2332 = vmatpush.xpose.msk.msrb.mxu3 %vm1291_vm0, %v1240_v62  ;;  %v1272_v62 = vld [vmem:[%s2895_s5 + $0x68] sm:$0xff] }
  0xa1   : > { %2319 = vmatmul.msk.f32.vlgmr.msrb.gmra.mxu1 %vm1291_vm0, %v1212_v1  ;;  %2312 = vmatmul.msk.f32.vlgmr.msrb.gmra.mxu0 %vm1291_vm0, %v1211_v3 }
  0xa2   : > { %2326 = vmatmul.msk.f32.vlgmr.msrb.gmra.mxu2 %vm1291_vm0, %v1213_v4  ;;  %1684 = vmatpush.msra.mxu0 %v1229_v34 }
  0xa3   : > { %2333 = vmatmul.msk.f32.vlgmr.msrb.gmra.mxu3 %vm1291_vm0, %v1214_v5  ;;  %1730 = vmatpush.msra.mxu2 %v1235_v38  ;;  %v1274_v5 = vld [vmem:[%s2895_s5 + $0x78] sm:$0xff] }
  0xa4   : > { %1685 = vmatpush.msra.mxu0 %v1228_v35  ;;  %1707 = vmatpush.msra.mxu1 %v1230_v40 }
  0xa5   : > { %1731 = vmatpush.msra.mxu2 %v1230_v40  ;;  %1753 = vmatpush.msra.mxu3 %v1237_v45 }
  0xa6   : > { %1686 = vmatpush.msra.mxu0 %v1227_v36  ;;  %1708 = vmatpush.msra.mxu1 %v1229_v34 }
  0xa7   : > { %1732 = vmatpush.msra.mxu2 %v1229_v34  ;;  %1754 = vmatpush.msra.mxu3 %v1235_v38 }
  0xa8   : > { %1687 = vmatpush.msra.mxu0 %v1260_v37  ;;  %1709 = vmatpush.msra.mxu1 %v1228_v35 }
  0xa9   : > { %1733 = vmatpush.msra.mxu2 %v1264_v42  ;;  %1755 = vmatpush.msra.mxu3 %v1230_v40 }
  0xaa   : > { %1688 = vmatpush.msra.mxu0 %v1259_v39  ;;  %1710 = vmatpush.msra.mxu1 %v1262_v43 }
  0xab   : > { %1734 = vmatpush.msra.mxu2 %v1263_v44  ;;  %1756 = vmatpush.msra.mxu3 %v1266_v47 }
  0xac   : > { %1689 = vmatpush.msra.mxu0 %v1241_v41  ;;  %1711 = vmatpush.msra.mxu1 %v1261_v46 }
  0xad   : > { %1735 = vmatpush.msra.mxu2 %v1241_v41  ;;  %1757 = vmatpush.msra.mxu3 %v1265_v49 }
  0xae   : > { %1712 = vmatpush.msra.mxu1 %v1241_v41  ;;  %1776 = vmatpush.msrb.mxu0 %v1233_v50 }
  0xaf   : > { %1758 = vmatpush.msra.mxu3 %v1241_v41  ;;  %1822 = vmatpush.msrb.mxu2 %v1236_v54 }
  0xb0   : > { %1799 = vmatpush.msrb.mxu1 %v1234_v48  ;;  %1777 = vmatpush.msrb.mxu0 %v1232_v51 }
  0xb1   : > { %1823 = vmatpush.msrb.mxu2 %v1234_v48  ;;  %1845 = vmatpush.msrb.mxu3 %v1238_v0 }
  0xb2   : > { %1800 = vmatpush.msrb.mxu1 %v1233_v50  ;;  %1778 = vmatpush.msrb.mxu0 %v1231_v52 }
  0xb3   : > { %1824 = vmatpush.msrb.mxu2 %v1233_v50  ;;  %1846 = vmatpush.msrb.mxu3 %v1236_v54 }
  0xb4   : > { %1801 = vmatpush.msrb.mxu1 %v1232_v51  ;;  %1779 = vmatpush.msrb.mxu0 %v1268_v55 }
  0xb5   : > { %1825 = vmatpush.msrb.mxu2 %v1272_v62  ;;  %1847 = vmatpush.msrb.mxu3 %v1234_v48 }
  0xb6   : > { %1802 = vmatpush.msrb.mxu1 %v1270_v53  ;;  %1780 = vmatpush.msrb.mxu0 %v1267_v58 }
  0xb7   : > { %1826 = vmatpush.msrb.mxu2 %v1271_v63  ;;  %1848 = vmatpush.msrb.mxu3 %v1274_v5 }
  0xb8   : > { %1803 = vmatpush.msrb.mxu1 %v1269_v56  ;;  %1781 = vmatpush.msrb.mxu0 %v1242_v60 }
  0xb9   : > { %1827 = vmatpush.msrb.mxu2 %v1242_v60 }
  0xba   : > { %1804 = vmatpush.msrb.mxu1 %v1242_v60 }
 0x106   : > { %v1330_v7 = vpop.f32.mrf.mxu0  ;;  %v1362_v10 = vpop.f32.mrf.mxu1 }
 0x107   : > { %v2849_v8 = vadd.f32 %v2416_v6, %v1330_v7  ;;  %v2855_v13 = vadd.f32 %v2418_v9, %v1362_v10 }
 0x109   : > { %v1567_v11 = vsel %vm1566_vm1, %v2849_v8, -inf  ;;  %v1570_v16 = vsel %vm1566_vm1, %v2855_v13, -inf }
 0x10a   : > { %1568 = vmax.xlane.f32.xlu1 %v1567_v11 }
 0x10e   : > { %v1426_v18 = vpop.f32.mrf.mxu3 }
 0x10f   : > { %v1394_v14 = vpop.f32.mrf.mxu2  ;;  %v2864_v20 = vadd.f32 %v2419_v17, %v1426_v18 }
 0x110   : > { %v2857_v15 = vadd.f32 %v2417_v12, %v1394_v14 }
 0x111   : > { %v1576_v21 = vsel %vm1566_vm1, %v2864_v20, -inf }
 0x112   : > { %v1573_v19 = vsel %vm1566_vm1, %v2857_v15, -inf  ;;  %1571 = vmax.xlane.f32.xlu1 %v1570_v16 }
 0x113   : > { %1574 = vmax.xlane.f32.xlu0 %v1573_v19 }
 0x11b   : > { %1577 = vmax.xlane.f32.xlu0 %v1576_v21 }
 0x11e   : > { %v1499_v22 = vpop.f32.mrf.mxu1  ;;  %v1467_v24 = vpop.f32.mrf.mxu0 }
 0x11f   : > { %v2868_v23 = vadd.f32 %v2418_v9, %v1499_v22  ;;  %v2870_v25 = vadd.f32 %v2416_v6, %v1467_v24  ;;  %v1273_v9 = vld [vmem:[%s2895_s5 + $0x70] sm:$0xff] }
 0x120   : > { %1849 = vmatpush.msrb.mxu3 %v1273_v9 }
 0x121   : > { %v1582_v26 = vsel %vm1566_vm1, %v2868_v23, -inf  ;;  %v1579_v27 = vsel %vm1566_vm1, %v2870_v25, -inf }
 0x122   : > { %1583 = vmax.xlane.f32.xlu1 %v1582_v26  ;;  %1850 = vmatpush.msrb.mxu3 %v1242_v60 }
 0x123   : > { %1580 = vmax.xlane.f32.xlu0 %v1579_v27 }
 0x125   : > { %v1531_v28 = vpop.f32.mrf.mxu2 }
 0x126   : > { %v2876_v29 = vadd.f32 %v2417_v12, %v1531_v28  ;;  %v1563_v30 = vpop.f32.mrf.mxu3 }
 0x127   : > { %v2880_v32 = vadd.f32 %v2419_v17, %v1563_v30 }
 0x128   : > { %v1585_v31 = vsel %vm1566_vm1, %v2876_v29, -inf }
 0x129   : > { %1586 = vmax.xlane.f32.xlu2 %v1585_v31  ;;  %v1588_v33 = vsel %vm1566_vm1, %v2880_v32, -inf }
 0x131   : > { %1589 = vmax.xlane.f32.xlu2 %v1588_v33 }
 0x17d   : > { %v1569_v57 = vpop.xlane.xlu1 %1568 }
 0x17e   : > { %v1591_v59 = vsub.f32 %v2849_v8, %v1569_v57 }
 0x180   : > { %v1599_v61 = vmul.f32 1.442695, %v1591_v59 }
 0x182   : > { %2420 = vpow2.f32 %v1599_v61 }
 0x185   : > { %v1572_v2 = vpop.xlane.xlu1 %1571 }
 0x186   : > { %v1575_v1 = vpop.xlane.xlu0 %1574  ;;  %v1592_v4 = vsub.f32 %v2855_v13, %v1572_v2 }
 0x187   : > { %v1593_v3 = vsub.f32 %v2857_v15, %v1575_v1 }
 0x188   : > { %v2421_v6 = vpop.eup %2420  ;;  %v1601_v8 = vmul.f32 1.442695, %v1592_v4 }
 0x189   : > { %v1603_v7 = vmul.f32 1.442695, %v1593_v3  ;;  %2334 = vmatmul.msk.f32.vlgmr.msra.gmra.mxu0 %vm1566_vm1, %v2421_v6  ;;  %v1615_v10 = vsel %vm1566_vm1, %v2421_v6, 0.0 }
 0x18a   : > { %1616 = vadd.xlane.f32.xlu2 %v1615_v10 }
 0x18b   : > { %2422 = vpow2.f32 %v1603_v7 }
 0x18c   : > { %2424 = vpow2.f32 %v1601_v8 }
 0x18e   : > { %v1578_v11 = vpop.xlane.xlu0 %1577 }
 0x18f   : > { %v1594_v12 = vsub.f32 %v2864_v20, %v1578_v11 }
 0x191   : > { %v2423_v13 = vpop.eup %2422  ;;  %v1605_v14 = vmul.f32 1.442695, %v1594_v12 }
 0x192   : > { %v2425_v15 = vpop.eup %2424  ;;  %2336 = vmatmul.msk.f32.vlgmr.msra.gmra.mxu2 %vm1566_vm1, %v2423_v13  ;;  %v1621_v16 = vsel %vm1566_vm1, %v2423_v13, 0.0 }
 0x193   : > { %2426 = vpow2.f32 %v1605_v14  ;;  %1622 = vadd.xlane.f32.xlu1 %v1621_v16  ;;  %2335 = vmatmul.msk.f32.vlgmr.msra.gmra.mxu1 %vm1566_vm1, %v2425_v15  ;;  %v1618_v17 = vsel %vm1566_vm1, %v2425_v15, 0.0 }
 0x194   : > { %1619 = vadd.xlane.f32.xlu0 %v1618_v17 }
 0x195   : > { %v1584_v18 = vpop.xlane.xlu1 %1583 }
 0x196   : > { %v1596_v19 = vsub.f32 %v2868_v23, %v1584_v18  ;;  %v1581_v22 = vpop.xlane.xlu0 %1580 }
 0x197   : > { %v1595_v20 = vsub.f32 %v2870_v25, %v1581_v22 }
 0x198   : > { %v1609_v21 = vmul.f32 1.442695, %v1596_v19 }
 0x199   : > { %v2427_v24 = vpop.eup %2426  ;;  %v1607_v26 = vmul.f32 1.442695, %v1595_v20 }
 0x19a   : > { %2428 = vpow2.f32 %v1609_v21  ;;  %2337 = vmatmul.msk.f32.vlgmr.msra.gmra.mxu3 %vm1566_vm1, %v2427_v24  ;;  %v1624_v27 = vsel %vm1566_vm1, %v2427_v24, 0.0 }
 0x19b   : > { %2430 = vpow2.f32 %v1607_v26  ;;  %1625 = vadd.xlane.f32.xlu2 %v1624_v27 }
 0x19c   : > { %v1587_v28 = vpop.xlane.xlu2 %1586 }
 0x19d   : > { %v1597_v30 = vsub.f32 %v2876_v29, %v1587_v28 }
 0x19f   : > { %v1611_v33 = vmul.f32 1.442695, %v1597_v30 }
 0x1a0   : > { %v2429_v31 = vpop.eup %2428 }
 0x1a1   : > { %2339 = vmatmul.msk.f32.vlgmr.msrb.gmra.mxu1 %vm1566_vm1, %v2429_v31  ;;  %v1630_v23 = vsel %vm1566_vm1, %v2429_v31, 0.0  ;;  %2432 = vpow2.f32 %v1611_v33  ;;  %v2431_v25 = vpop.eup %2430 }
 0x1a2   : > { %1631 = vadd.xlane.f32.xlu1 %v1630_v23  ;;  %2338 = vmatmul.msk.f32.vlgmr.msrb.gmra.mxu0 %vm1566_vm1, %v2431_v25  ;;  %v1627_v34 = vsel %vm1566_vm1, %v2431_v25, 0.0 }
 0x1a3   : > { %1628 = vadd.xlane.f32.xlu0 %v1627_v34 }
 0x1a4   : > { %v1590_v35 = vpop.xlane.xlu2 %1589 }
 0x1a5   : > { %v1598_v36 = vsub.f32 %v2880_v32, %v1590_v35 }
 0x1a7   : > { %v2433_v37 = vpop.eup %2432  ;;  %v1613_v38 = vmul.f32 1.442695, %v1598_v36 }
 0x1a8   : > { %2340 = vmatmul.msk.f32.vlgmr.msrb.gmra.mxu2 %vm1566_vm1, %v2433_v37  ;;  %v1633_v29 = vsel %vm1566_vm1, %v2433_v37, 0.0 }
 0x1a9   : > { %2434 = vpow2.f32 %v1613_v38  ;;  %1634 = vadd.xlane.f32.xlu2 %v1633_v29 }
 0x1af   : > { %v2435_v39 = vpop.eup %2434 }
 0x1b0   : > { %2341 = vmatmul.msk.f32.vlgmr.msrb.gmra.mxu3 %vm1566_vm1, %v2435_v39  ;;  %v1636_v40 = vsel %vm1566_vm1, %v2435_v39, 0.0 }
 0x1b1   : > { %1637 = vadd.xlane.f32.xlu0 %v1636_v40 }
 0x1fd   : > { %v1617_v41 = vpop.xlane.xlu2 %1616 }
 0x1fe   : > { %2436 = vrcp.f32 %v1617_v41 }
 0x204   : > { %v2437_v42 = vpop.eup %2436 }
 0x205   : > { %v1647_v43 = vmul.f32 %v2437_v42, %v1617_v41 }
 0x206   : > { %v1623_v32 = vpop.xlane.xlu1 %1622  ;;  %v1691_v47 = vpop.f32.mrf.mxu0 }
 0x207   : > { %2438 = vrcp.f32 %v1623_v32  ;;  %v1620_v44 = vpop.xlane.xlu0 %1619  ;;  %v1655_v45 = vsub.f32 2.0, %v1647_v43 }
 0x208   : > { %2440 = vrcp.f32 %v1620_v44 }
 0x209   : > { %v1663_v46 = vmul.f32 %v2437_v42, %v1655_v45 }
 0x20b   : > { %v1855_v48 = vmul.f32 %v1691_v47, %v1663_v46 }
 0x20d   : > { %v2439_v49 = vpop.eup %2438  ;;  %1863 = vst.msk [vmem:[%s2962_s19] sm:$0xff] %vm1291_vm0, %v1855_v48 }
 0x20e   : > { %v2441_v50 = vpop.eup %2440  ;;  %v1649_v51 = vmul.f32 %v2439_v49, %v1623_v32  ;;  %v1626_v52 = vpop.xlane.xlu2 %1625 }
 0x20f   : > { %v1648_v53 = vmul.f32 %v2441_v50, %v1620_v44  ;;  %2442 = vrcp.f32 %v1626_v52 }
 0x210   : > { %v1657_v54 = vsub.f32 2.0, %v1649_v51  ;;  %v1714_v58 = vpop.f32.mrf.mxu1 }
 0x211   : > { %v1656_v55 = vsub.f32 2.0, %v1648_v53 }
 0x212   : > { %v1665_v59 = vmul.f32 %v2439_v49, %v1657_v54 }
 0x213   : > { %v1664_v56 = vmul.f32 %v2441_v50, %v1656_v55 }
 0x215   : > { %v1632_v57 = vpop.xlane.xlu1 %1631  ;;  %v2443_v60 = vpop.eup %2442  ;;  %v1856_v61 = vmul.f32 %v1714_v58, %v1664_v56 }
 0x216   : > { %2444 = vrcp.f32 %v1632_v57  ;;  %v1737_v62 = vpop.f32.mrf.mxu2  ;;  %v1650_v63 = vmul.f32 %v2443_v60, %v1626_v52  ;;  %v1629_v1 = vpop.xlane.xlu0 %1628 }
 0x217   : > { %v1857_v0 = vmul.f32 %v1737_v62, %v1665_v59  ;;  %1864 = vst.msk [vmem:[%s2962_s19 + $0x8] sm:$0xff] %vm1291_vm0, %v1856_v61  ;;  %2446 = vrcp.f32 %v1629_v1 }
 0x218   : > { %v1658_v2 = vsub.f32 2.0, %v1650_v63 }
 0x219   : > { %1865 = vst.msk [vmem:[%s2962_s19 + $0x10] sm:$0xff] %vm1291_vm0, %v1857_v0 }
 0x21a   : > { %v1666_v6 = vmul.f32 %v2443_v60, %v1658_v2 }
 0x21c   : > { %v2445_v3 = vpop.eup %2444  ;;  %v1635_v5 = vpop.xlane.xlu2 %1634 }
 0x21d   : > { %v1652_v4 = vmul.f32 %v2445_v3, %v1632_v57  ;;  %2448 = vrcp.f32 %v1635_v5  ;;  %v2447_v7 = vpop.eup %2446  ;;  %v1760_v9 = vpop.f32.mrf.mxu3 }
 0x21e   : > { %v1651_v10 = vmul.f32 %v2447_v7, %v1629_v1  ;;  %v1858_v11 = vmul.f32 %v1760_v9, %v1666_v6  ;;  %v1806_v14 = vpop.f32.mrf.mxu1 }
 0x21f   : > { %v1660_v8 = vsub.f32 2.0, %v1652_v4  ;;  %v1783_v19 = vpop.f32.mrf.mxu0 }
 0x220   : > { %v1659_v13 = vsub.f32 2.0, %v1651_v10  ;;  %1866 = vst.msk [vmem:[%s2962_s19 + $0x18] sm:$0xff] %vm1291_vm0, %v1858_v11 }
 0x221   : > { %v1668_v12 = vmul.f32 %v2445_v3, %v1660_v8 }
 0x222   : > { %v1667_v17 = vmul.f32 %v2447_v7, %v1659_v13 }
 0x223   : > { %v1860_v15 = vmul.f32 %v1806_v14, %v1668_v12  ;;  %v2449_v16 = vpop.eup %2448 }
 0x224   : > { %v1653_v18 = vmul.f32 %v2449_v16, %v1635_v5  ;;  %v1638_v21 = vpop.xlane.xlu0 %1637  ;;  %v1859_v22 = vmul.f32 %v1783_v19, %v1667_v17 }
 0x225   : > { %1868 = vst.msk [vmem:[%s2962_s19 + $0x28] sm:$0xff] %vm1291_vm0, %v1860_v15  ;;  %2450 = vrcp.f32 %v1638_v21 }
 0x226   : > { %v1661_v20 = vsub.f32 2.0, %v1653_v18  ;;  %1867 = vst.msk [vmem:[%s2962_s19 + $0x20] sm:$0xff] %vm1291_vm0, %v1859_v22 }
 0x228   : > { %v1669_v24 = vmul.f32 %v2449_v16, %v1661_v20 }
 0x22b   : > { %v2451_v26 = vpop.eup %2450  ;;  %v1829_v27 = vpop.f32.mrf.mxu2 }
 0x22c   : > { %v1654_v28 = vmul.f32 %v2451_v26, %v1638_v21  ;;  %v1861_v30 = vmul.f32 %v1829_v27, %v1669_v24 }
 0x22e   : > { %v1662_v31 = vsub.f32 2.0, %v1654_v28  ;;  %1869 = vst.msk [vmem:[%s2962_s19 + $0x30] sm:$0xff] %vm1291_vm0, %v1861_v30 }
 0x230   : > { %v1670_v33 = vmul.f32 %v2451_v26, %v1662_v31 }
 0x233   : > { %v1852_v23 = vpop.f32.mrf.mxu3 }
 0x234   : > { %v1862_v25 = vmul.f32 %v1852_v23, %v1670_v33 }
 0x236   : > { %1870 = vst.msk [vmem:[%s2962_s19 + $0x38] sm:$0xff] %vm1291_vm0, %v1862_v25 }
 0x237   : > { %2479 = shalt.err (!%p2476_p8)
}
 0x238   : > { %s2532_s13 = smov 128   ;;  %s2533_s16 = smov 8  }
 0x239   : > { %2359 = dma.vmem_to_hbm [thread:$0]  (%p2642_p5), %s1890_s6, 1024, %s1892_s7, %s1872_s24, %s2532_s13, %s2532_s13, %s2533_s16  }
 0x23a PF: > { %s3062_s17 = sld [smem:[#allocation11_spill]]  ;;  %p2362_p11 = pnand %p2232_p10, %p2653_p9 }
 0x23c   : > { %p2363_p12 = pneg %p2362_p11 }
 0x240   : > { %s1906_s19 = sand.u32 1, %s3062_s17  }
 0x241   : > { %s1907_s15 = scalar_lea.sflag [#allocation9], %s1906_s19 }
 0x242   : > { %2505 = dma.done.wait (%p2363_p12), %s1907_s15, 1024  }
 0x243   : > { %2507 = vsyncadd (%p2363_p12), %s1907_s15, 4294966272  ;;  %s25_s26 = sadd.s32 1, %s2530_s26   ;;  %s3064_s28 = sld [smem:[#allocation13_spill]] }
 0x244   : > { %p22_p13 = scmp.ge.s32.totalorder %s25_s26, 4   ;;  %s3065_s14 = sld [smem:[#allocation12_spill]] }
 0x245   : > { %s3066_s21 = smov %s2514_s22  ;;  %s3067_s22 = smov %s2518_s23 }
 0x246   : > { %s3069_s24 = smov %s2526_s25  ;;  %24 = sbr.rel (!%p22_p13) target bundleno = 11 (0xb), region = 394 }
 0x249   : > { %s3068_s23 = smov %s3064_s28 }
 0x24a   : > { %s3070_s25 = smov %s3065_s14 }
 0x24b   :  { %1913 = vsyncpa [#allocation9], 1 }
 0x24c   :  { %1915 = vsyncpa [#allocation9 + $0x1], 1 }

</bundles_post_ra>
